<compile_context>
chip_gen: v7x
topology: tpu7x:2x2x1
jax: 0.10.0
libtpu: 0.0.40
codegen_flags: <defaults>
</compile_context>

<pallas_src>
import functools
import math

import jax
import jax.numpy as jnp
from jax.experimental import pallas as pl
from jax.experimental.pallas import tpu as pltpu


def _round_up(a, b):
    return -(-a // b) * b


def _label_smoothing_kernel(x_ref, tgt_ref, out_ref, *,
                            n_rows, tile_n, chunk, padding_idx, conf, base):
    """Per tile: out = sum over valid rows of sum_j true_dist[r, j] * x[r, j]."""
    V = x_ref.shape[1]
    n_chunks = tile_n // chunk
    tile_base = pl.program_id(0) * tile_n

    # Loop-invariant iotas, hoisted out of the chunk loop.
    col = jax.lax.broadcasted_iota(jnp.int32, (chunk, V), 1)   # (chunk, V)
    rid = jax.lax.broadcasted_iota(jnp.int32, (chunk, 1), 0)   # (chunk, 1)

    def body(c, total):
        start = pl.multiple_of(c * chunk, chunk)
        x = x_ref[pl.ds(start, chunk), :].astype(jnp.float32)   # (chunk, V)
        tgt = tgt_ref[pl.ds(start, chunk), :]                   # (chunk, 1) int32

        # sum_j td[r,j]*x[r,j] = sum_j where(j==tgt, conf, base)*x[r,j]
        #                        - base * x[r, padding_idx]          (valid rows)
        w = jnp.where(col == tgt, jnp.float32(conf), jnp.float32(base))
        s = jnp.sum(w * x, axis=-1, keepdims=True)               # (chunk, 1), XLU
        s = s - jnp.float32(base) * x[:, padding_idx:padding_idx + 1]

        # Rows with target == padding_idx contribute 0; rows past the logical end
        # (partial edge block) hold garbage and are dropped by the select.
        valid = (tgt != padding_idx) & ((tile_base + start + rid) < n_rows)
        s = jnp.where(valid, s, jnp.float32(0.0))
        return total + jnp.sum(s, axis=None, keepdims=True)      # (1, 1)

    total = jax.lax.fori_loop(0, n_chunks, body, jnp.zeros((1, 1), jnp.float32))
    # Lane/sublane-aligned per-tile partial; wrapper reads [:, 0, 0].
    out_ref[0] = jnp.broadcast_to(total, (8, 128))


def label_smoothing_loss(x, target, *, size, padding_idx, smoothing,
                         tile_n=None, block_bytes=8 << 20):
    """x: (N, size) log-probabilities (f32 or bf16); target: (N,) int ids -> scalar loss.

    Pass bf16 log-probs to halve HBM traffic; the kernel upcasts to f32 internally.
    """
    N, V = x.shape
    assert V == size
    itemsize = x.dtype.itemsize

    # Row-chunk for the strip-mined in-kernel reduction (~512 KiB of f32 temporaries).
    chunk = max(8, min(1024, ((512 << 10) // (V * 4)) // 8 * 8))
    chunk = min(chunk, _round_up(N, 8))

    if tile_n is None:
        # Budget the x block plus the 128-lane-padded (tile_n, 1) int32 target block.
        rows = max(chunk, (block_bytes // (V * itemsize + 512)) // chunk * chunk)
        cap_n = _round_up(N, chunk)                      # don't exceed the (padded) data
        cap_quarter = max(chunk, _round_up(pl.cdiv(N, 4), chunk))  # >=4 tiles when possible
        tile_n = min(rows, cap_n, cap_quarter)
    else:
        tile_n = int(tile_n)
        chunk = min(chunk, tile_n)
        if tile_n % chunk:
            chunk = 8
    assert tile_n % 8 == 0 and tile_n % chunk == 0

    num_tiles = pl.cdiv(N, tile_n)

    confidence = 1.0 - smoothing
    base = smoothing / (size - 2)

    tgt2 = target.reshape(N, 1).astype(jnp.int32)

    kernel = functools.partial(
        _label_smoothing_kernel,
        n_rows=N, tile_n=tile_n, chunk=chunk,
        padding_idx=int(padding_idx), conf=float(confidence), base=float(base))

    partials = pl.pallas_call(
        kernel,
        out_shape=jax.ShapeDtypeStruct((num_tiles, 8, 128), jnp.float32),
        grid_spec=pltpu.PrefetchScalarGridSpec(
            num_scalar_prefetch=0,
            grid=(num_tiles,),
            in_specs=[
                pl.BlockSpec((tile_n, V), lambda i: (i, 0)),
                pl.BlockSpec((tile_n, 1), lambda i: (i, 0)),
            ],
            out_specs=pl.BlockSpec((1, 8, 128), lambda i: (i, 0, 0)),
        ),
        compiler_params=pltpu.CompilerParams(
            dimension_semantics=("parallel",),   # megacore-shardable
            vmem_limit_bytes=48 << 20,           # safe on v7x (64 MiB), raises v5e default
        ),
    )(x, tgt2)

    cross = jnp.sum(partials[:, 0, 0])           # sum over valid rows of td . x

    # Constant entropy term sum(td * log td), folded outside the kernel.
    log_conf = math.log(confidence) if confidence > 0.0 else 0.0
    log_base = math.log(base) if base > 0.0 else 0.0
    h_row = confidence * log_conf + (size - 2) * base * log_base
    num_valid = jnp.sum((target != padding_idx).astype(jnp.float32))

    return num_valid * jnp.float32(h_row) - cross


def _reference_loss(x, target, *, size, padding_idx, smoothing):
    # Pure-JAX reference mirroring the PyTorch forward.
    N, V = x.shape
    confidence = 1.0 - smoothing
    td = jnp.full((N, V), smoothing / (size - 2), dtype=jnp.float32)
    td = td.at[jnp.arange(N), target].set(confidence)
    td = td.at[:, padding_idx].set(0.0)
    td = jnp.where((target == padding_idx)[:, None], 0.0, td)
    pos = td > 0
    safe_log = jnp.where(pos, jnp.log(jnp.where(pos, td, 1.0)), 0.0)
    return jnp.sum(jnp.where(pos, td * (safe_log - x.astype(jnp.float32)), 0.0))


if __name__ == "__main__":
    SIZE = 128          # vocab / class dim (x.size(1))
    PADDING_IDX = 0
    SMOOTHING = 0.1

    key = jax.random.PRNGKey(0)
    k1, k2, k3, k4, k5, k6 = jax.random.split(key, 6)

    # Case 1: small batch, auto tiling (single tile), f32 log-probs.
    N = 16
    x = jax.nn.log_softmax(jax.random.normal(k1, (N, SIZE), jnp.float32), axis=-1)
    target = jax.random.randint(k2, (N,), 0, SIZE, dtype=jnp.int32)
    target = target.at[3].set(PADDING_IDX).at[10].set(PADDING_IDX)
    loss = jax.block_until_ready(label_smoothing_loss(
        x, target, size=SIZE, padding_idx=PADDING_IDX, smoothing=SMOOTHING))
    ref = _reference_loss(x, target, size=SIZE, padding_idx=PADDING_IDX, smoothing=SMOOTHING)
    assert jnp.allclose(loss, ref, rtol=1e-5, atol=1e-4), (loss, ref)

    # Case 2: ragged N across multiple tiles (no-pad tail-masking path, partial last block).
    N2 = 20
    x2 = jax.nn.log_softmax(jax.random.normal(k3, (N2, SIZE), jnp.float32), axis=-1)
    t2 = jax.random.randint(k4, (N2,), 0, SIZE, dtype=jnp.int32)
    t2 = t2.at[5].set(PADDING_IDX).at[17].set(PADDING_IDX)
    loss2 = jax.block_until_ready(label_smoothing_loss(
        x2, t2, size=SIZE, padding_idx=PADDING_IDX, smoothing=SMOOTHING, tile_n=8))
    ref2 = _reference_loss(x2, t2, size=SIZE, padding_idx=PADDING_IDX, smoothing=SMOOTHING)
    assert jnp.allclose(loss2, ref2, rtol=1e-5, atol=1e-4), (loss2, ref2)

    # Case 3: bf16 log-probs (halved HBM traffic path); kernel upcasts per chunk.
    N3 = 16
    x3 = jax.nn.log_softmax(
        jax.random.normal(k5, (N3, SIZE), jnp.float32), axis=-1).astype(jnp.bfloat16)
    t3 = jax.random.randint(k6, (N3,), 0, SIZE, dtype=jnp.int32)
    t3 = t3.at[7].set(PADDING_IDX)
    loss3 = jax.block_until_ready(label_smoothing_loss(
        x3, t3, size=SIZE, padding_idx=PADDING_IDX, smoothing=SMOOTHING))
    ref3 = _reference_loss(x3, t3, size=SIZE, padding_idx=PADDING_IDX, smoothing=SMOOTHING)
    assert jnp.allclose(loss3, ref3, rtol=1e-5, atol=1e-4), (loss3, ref3)

    # TODO(synk): when V is not a multiple of 128, the in-kernel lane reduce relies on
    # Mosaic masking the padded lanes of jnp.sum(axis=-1); re-verify if that path is used.
    print("KERNEL_OK")
</pallas_src>

<mosaic_0001>
module attributes {stable_mosaic.version = 11 : i64} {
  func.func @_label_smoothing_kernel(%arg0: i32, %arg1: memref<16x128xf32, #tpu.memory_space<vmem>>, %arg2: memref<16x1xi32, #tpu.memory_space<vmem>>, %arg3: memref<1x8x128xf32, #tpu.memory_space<vmem>>) attributes {dimension_semantics = [#tpu.dimension_semantics<parallel>], iteration_bounds = array<i64: 1>, scalar_prefetch = 0 : i64, scratch_operands = 0 : i64, tpu.core_type = #tpu.core_type<tc>, window_params = [{transform_indices = @transform_0, window_bounds = array<i64: 16, 128>}, {transform_indices = @transform_1, window_bounds = array<i64: 16, 1>}, {transform_indices = @transform_2, window_bounds = array<i64: 1, 8, 128>}]} {
    %c16_i32 = arith.constant 16 : i32
    %0 = arith.muli %arg0, %c16_i32 : i32
    %1 = tpu.iota {dimensions = array<i32: 1>} : vector<16x128xi32>
    %2 = tpu.iota {dimensions = array<i32: 0>} : vector<16x1xi32>
    %cst = arith.constant 0.000000e+00 : f32
    %3 = vector.broadcast %cst : f32 to vector<1x1xf32>
    %c0_i32 = arith.constant 0 : i32
    %c16_i32_0 = arith.constant 16 : i32
    %4 = arith.muli %c0_i32, %c16_i32_0 : i32
    %5 = tpu.assume_multiple %4, 16 : i32
    %6 = arith.index_cast %5 : i32 to index
    %c0 = arith.constant 0 : index
    %7 = vector.load %arg1[%6, %c0] : memref<16x128xf32, #tpu.memory_space<vmem>>, vector<16x128xf32>
    %8 = arith.index_cast %5 : i32 to index
    %c0_1 = arith.constant 0 : index
    %9 = vector.load %arg2[%8, %c0_1] : memref<16x1xi32, #tpu.memory_space<vmem>>, vector<16x1xi32>
    %10 = vector.broadcast %9 : vector<16x1xi32> to vector<16x128xi32>
    %11 = arith.cmpi eq, %1, %10 : vector<16x128xi32>
    %cst_2 = arith.constant 0.899999976 : f32
    %cst_3 = arith.constant 7.93650805E-4 : f32
    %12 = vector.broadcast %cst_2 : f32 to vector<16x128xf32>
    %13 = vector.broadcast %cst_3 : f32 to vector<16x128xf32>
    %14 = arith.select %11, %12, %13 : vector<16x128xi1>, vector<16x128xf32>
    %15 = arith.mulf %14, %7 : vector<16x128xf32>
    %cst_4 = arith.constant dense<0.000000e+00> : vector<16xf32>
    %16 = vector.multi_reduction <add>, %15, %cst_4 [1] : vector<16x128xf32> to vector<16xf32>
    %17 = vector.shape_cast %16 : vector<16xf32> to vector<16x1xf32>
    %18 = vector.extract_strided_slice %7 {offsets = [0, 0], sizes = [16, 1], strides = [1, 1]} : vector<16x128xf32> to vector<16x1xf32>
    %cst_5 = arith.constant 7.93650805E-4 : f32
    %19 = vector.broadcast %cst_5 : f32 to vector<16x1xf32>
    %20 = arith.mulf %19, %18 : vector<16x1xf32>
    %21 = arith.subf %17, %20 : vector<16x1xf32>
    %c0_i32_6 = arith.constant 0 : i32
    %22 = vector.broadcast %c0_i32_6 : i32 to vector<16x1xi32>
    %23 = arith.cmpi ne, %9, %22 : vector<16x1xi32>
    %24 = arith.addi %0, %5 : i32
    %25 = vector.broadcast %24 : i32 to vector<16x1xi32>
    %26 = arith.addi %25, %2 : vector<16x1xi32>
    %c16_i32_7 = arith.constant 16 : i32
    %27 = vector.broadcast %c16_i32_7 : i32 to vector<16x1xi32>
    %28 = arith.cmpi slt, %26, %27 : vector<16x1xi32>
    %29 = arith.andi %23, %28 : vector<16x1xi1>
    %cst_8 = arith.constant 0.000000e+00 : f32
    %30 = vector.broadcast %cst_8 : f32 to vector<16x1xf32>
    %31 = arith.select %29, %21, %30 : vector<16x1xi1>, vector<16x1xf32>
    %32 = vector.shape_cast %31 : vector<16x1xf32> to vector<1x16x1xf32>
    %cst_9 = arith.constant dense<0.000000e+00> : vector<1xf32>
    %33 = vector.multi_reduction <add>, %32, %cst_9 [1, 2] : vector<1x16x1xf32> to vector<1xf32>
    %34 = vector.shape_cast %33 : vector<1xf32> to vector<1x1x1xf32>
    %35 = vector.extract %34[0, 0, 0] : f32 from vector<1x1x1xf32>
    %36 = vector.broadcast %35 : f32 to vector<1x1xf32>
    %37 = arith.addf %3, %36 : vector<1x1xf32>
    %c1_i32 = arith.constant 1 : i32
    %38 = vector.shape_cast %37 : vector<1x1xf32> to vector<1x1xf32>
    %39 = vector.broadcast %38 : vector<1x1xf32> to vector<8x128xf32>
    %c0_10 = arith.constant 0 : index
    %c0_11 = arith.constant 0 : index
    %c0_12 = arith.constant 0 : index
    %40 = vector.load %arg3[%c0_10, %c0_11, %c0_12] : memref<1x8x128xf32, #tpu.memory_space<vmem>>, vector<1x8x128xf32>
    %41 = vector.shape_cast %40 : vector<1x8x128xf32> to vector<8x128xf32>
    %42 = vector.shape_cast %39 : vector<8x128xf32> to vector<1x8x128xf32>
    tpu.vector_store %arg3[%c0_10, %c0_11, %c0_12], %42 {strides = array<i32>} : memref<1x8x128xf32, #tpu.memory_space<vmem>>, vector<1x8x128xf32>,
    return
  }
  func.func @transform_0(%arg0: i32) -> (i32, i32) {
    %c0_i32 = arith.constant 0 : i32
    %c0_i32_0 = arith.constant 0 : i32
    return %arg0, %c0_i32 : i32, i32
  }
  func.func @transform_1(%arg0: i32) -> (i32, i32) {
    %c0_i32 = arith.constant 0 : i32
    %c0_i32_0 = arith.constant 0 : i32
    return %arg0, %c0_i32 : i32, i32
  }
  func.func @transform_2(%arg0: i32) -> (i32, i32, i32) {
    %c0_i32 = arith.constant 0 : i32
    %c0_i32_0 = arith.constant 0 : i32
    %c0_i32_1 = arith.constant 0 : i32
    return %arg0, %c0_i32, %c0_i32_0 : i32, i32, i32
  }
}

</mosaic_0001>

<bundles_post_ra>
// kernel: tpu_custom_call.1
= control target key start
LH: loop header
LB: loop body
LE: loop exit
PB: predicated region body
PF: predicated region fallthrough
CT: control target
= control target key end

     0   :  { %s156_s0 = inlined_call_operand.vmem [shape: f32[16,128], index: 0, kind: input, shape index: {}]   ;;  %s157_s1 = inlined_call_operand.vmem [shape: s32[16,1], index: 1, kind: input, shape index: {}]   ;;  %s158_s2 = inlined_call_operand.hbm [shape: f32[1,8,128], index: 2, kind: output, shape index: {}]  }
   0x1   :  { %v20_v0 = vld [vmem:[%s157_s1] sm:$0xff] }
   0x2   :  { %7 = vsyncpa [#allocation3], 0  ;;  %v114_v1 = vmov 0   ;;  %v21_v2 = vld [vmem:[%s157_s1 + $0x8] sm:$0xff]  ;;  %v13_v3 = vlaneseq  ;;  %v18_v6 = vld [vmem:[%s156_s0] sm:$0xff]  ;;  %vm42_vm2 = vcmp.ne.s32.totalorder %v20_v0, 0 }
   0x3   :  { %89 = vset.pattern.permute.xlu0 %v114_v1  ;;  %v115_v7 = vmov 0.0007936508   ;;  %v19_v11 = vld [vmem:[%s156_s0 + $0x8] sm:$0xff]  ;;  %v38_v14 = vmul.f32 0.0007936508, %v18_v6  ;;  %vm43_vm3 = vcmp.ne.s32.totalorder %v21_v2, 0 }
   0x4   :  { %23 = vperm.xlu0 %89, %v20_v0   ;;  %v14_v4 = vand.u32 127, %v13_v3  ;;  %v39_v17 = vmul.f32 0.0007936508, %v19_v11  ;;  %vm54_vm4 = vcmask 7168   ;;  %s116_s0 = smov [#allocation2]  }
   0x5   :  { %s76_s1 = sshll.u32 %s116_s0, 4  ;;  %s77_s1 = int_to_ptr.vmem [resolvable:$true] %s76_s1 }
   0x6   :  { %s90_s18 = scalar_lea.vmem %s77_s1, 128  ;;  %p95_p1 = scmp.lt.s32.totalorder %s77_s1, %s77_s1 }
   0x7   :  { %p91_p0 = scmp.ne.s32.totalorder %s77_s1, %s90_s18  ;;  %p96_p2 = scmp.lt.s32.totalorder %s90_s18, %s90_s18 }
   0x8   :  { %26 = vperm.xlu0 %89, %v21_v2  }
   0x9   :  { %p97_p3 = por %p96_p2, %p95_p1 }
   0xb   :  { %p98_p4 = pnand %p97_p3, %p91_p0 }
  0x83   :  { %v24_v5 = vpop.permute.xlu0 %23 }
  0x84   :  { %vm28_vm0 = vcmp.eq.s32.totalorder %v14_v4, %v24_v5 }
  0x85   :  { %v30_v8 = vsel %vm28_vm0, 0.9, %v115_v7 }
  0x86   :  { %v32_v9 = vmul.f32 %v30_v8, %v18_v6 }
  0x87   :  { %v27_v10 = vpop.permute.xlu0 %26 }
  0x88   :  { %vm29_vm1 = vcmp.eq.s32.totalorder %v14_v4, %v27_v10  ;;  %34 = vadd.xlane.f32.xlu1 %v32_v9 }
  0x89   :  { %v31_v12 = vsel %vm29_vm1, 0.9, %v115_v7 }
  0x8a   :  { %v33_v13 = vmul.f32 %v31_v12, %v19_v11 }
  0x8c   :  { %36 = vadd.xlane.f32.xlu1 %v33_v13 }
 0x115   :  { %v35_v15 = vpop.xlane.xlu1 %34 }
 0x116   :  { %v40_v16 = vsub.f32 %v35_v15, %v38_v14 }
 0x118   :  { %v52_v19 = vsel %vm42_vm2, %v40_v16, 0.0 }
 0x119   :  { %v37_v18 = vpop.xlane.xlu1 %36  ;;  %v55_v22 = vsel %vm54_vm4, %v52_v19, 0.0 }
 0x11a   :  { %v41_v20 = vsub.f32 %v37_v18, %v39_v17 }
 0x11c   :  { %v53_v21 = vsel %vm43_vm3, %v41_v20, 0.0 }
 0x11d   :  { %v56_v23 = vsel %vm54_vm4, %v53_v21, 0.0 }
 0x11e   :  { %v57_v24 = vadd.f32 %v56_v23, %v55_v22 }
 0x120   :  { %58 = vadd.xlane.f32.xlu0 %v57_v24 }
 0x1ad   :  { %v59_v25 = vpop.xlane.xlu0 %58 }
 0x1ae   :  { %v60_v26 = vrot.slane %v59_v25, 4 }
 0x1b0   :  { %v61_v27 = vadd.f32 %v60_v26, %v59_v25 }
 0x1b2   :  { %v62_v28 = vrot.slane %v61_v27, 2 }
 0x1b4   :  { %v63_v29 = vadd.f32 %v62_v28, %v61_v27 }
 0x1b6   :  { %v64_v30 = vrot.slane %v63_v29, 1 }
 0x1b8   :  { %v65_v31 = vadd.f32 %v64_v30, %v63_v29 }
 0x1ba   :  { %84 = vpush %v65_v31 }
 0x1eb   :  { %s85_s17 = spop %84 }
 0x1ec   :  { %v67_v32 = vstv %s85_s17 }
 0x1ed   :  { %69 = vst [vmem:[#allocation2] sm:$0xff] %v67_v32 }
 0x1ee   :  { %101 = shalt.err (!%p98_p4)
}
 0x1ef   :  { %s102_s21 = scalar_lea.hbm %s158_s2, 128 }
 0x1f0   :  { %p103_p5 = scmp.ne.s32.totalorder %s158_s2, %s102_s21  ;;  %p106_p6 = scmp.lt.u32.totalorder %s102_s21, %s158_s2 }
 0x1f2   :  { %p108_p7 = pnand %p106_p6, %p103_p5 }
 0x1f4   :  { %111 = shalt.err (!%p108_p7)
}
 0x1f5   :  { %79 = dma.vmem_to_hbm [thread:$0]  %s77_s1, 128, %s158_s2, [#allocation3]  }
 0x1f6   :  { %112 = dma.done.wait [#allocation3], 128  }
 0x1f7   :  { %113 = vsyncadd [#allocation3], 4294967168 }
 0x1f8   :  { %83 = vsyncpa [#allocation3], 1 }

</bundles_post_ra>
